<compile_context>
chip_gen: v6e
topology: v6e:2x2x1
jax: 0.10.0
libtpu: 0.0.40
codegen_flags: <defaults>
</compile_context>

<pallas_src>
import jax
import jax.numpy as jnp
from jax.experimental import pallas as pl
from jax.experimental.pallas import tpu as pltpu


def _round_up(x: int, m: int) -> int:
    return (x + m - 1) // m * m


def afn_kernel(x_ref, wf_ref, bf_ref, wi_ref, bi_ref, o_ref):
    # Fused feature extractors: relu(x @ Wf_all + bf_all)  -> [tb, UHp]
    h = jnp.dot(x_ref[...], wf_ref[...], preferred_element_type=jnp.float32)
    h = jnp.maximum(h + bf_ref[...], 0.0).astype(x_ref.dtype)
    # Integrated unit applied to the (implicit) concat:    -> [tb, O]
    out = jnp.dot(h, wi_ref[...], preferred_element_type=jnp.float32)
    o_ref[...] = (out + bi_ref[...]).astype(o_ref.dtype)


def prepare_afn_params(Wf, bf, Wi, bi, *, pad_out: bool = False):
    """One-time parameter preparation (do at model init, NOT per forward call).

    Wf: [U, D, H] per-unit feature-extractor weights (x @ Wf[u] convention)
    bf: [U, 1, H]
    Wi: [U, H, O] integrated Linear weight, rows in concat (unit-major) order
    bi: [1, O]
    """
    U, D, H = Wf.shape
    O = Wi.shape[-1]
    UH = U * H
    LANE = 128
    UHp = _round_up(UH, LANE)                 # lane-dense hidden; one-time and exact (zeros)
    Op = _round_up(O, LANE) if pad_out else O

    Wf_all = jnp.transpose(Wf, (1, 0, 2)).reshape(D, UH)   # columns in torch.cat order
    Wi_cat = Wi.reshape(UH, O)                             # rows in torch.cat order

    return {
        "Wf": jnp.zeros((D, UHp), Wf.dtype).at[:, :UH].set(Wf_all),
        "bf": jnp.zeros((1, UHp), bf.dtype).at[:, :UH].set(bf.reshape(1, UH)),
        "Wi": jnp.zeros((UHp, Op), Wi.dtype).at[:UH, :O].set(Wi_cat),
        "bi": jnp.zeros((1, Op), bi.dtype).at[:, :O].set(bi.reshape(1, O)),
        "out_features": O,
    }


def afn_forward(x, params, *, block_b: int = 256):
    """x: [B, D]; params: output of prepare_afn_params."""
    B, D = x.shape
    Wfp, bfp, Wip, bip = params["Wf"], params["bf"], params["Wi"], params["bi"]
    O = params["out_features"]
    UHp = Wfp.shape[1]
    Op = Wip.shape[1]
    assert Wfp.shape[0] == D, "input feature dim mismatch with prepared params"

    # Batch tile: multiple of 8 sublanes; 256 fills the 256-wide MXU on v6e/v7x.
    # (v7x megacore note: pick block_b <= B//2 when B is large so n_b >= 2.)
    tb = min(block_b, _round_up(B, 8))
    n_b = pl.cdiv(B, tb)

    x_isz = jnp.dtype(x.dtype).itemsize
    w_isz = jnp.dtype(Wfp.dtype).itemsize
    cost = pl.CostEstimate(
        flops=2 * B * D * UHp + 2 * B * UHp * Op,
        transcendentals=0,
        bytes_accessed=(B * D + B * Op) * x_isz
        + (D * UHp + UHp + UHp * Op + Op) * w_isz,
    )

    # VMEM budget: single-buffered weights + double-buffered x/out tiles + f32 h tile.
    # TODO(synk): if the resident weights alone approach ~40 MiB (v7x has 64 MiB/TC),
    # switch to a UH-tiled "arbitrary" grid axis with an f32 accumulator scratch.
    weight_bytes = (D * UHp + UHp + UHp * Op + Op) * w_isz
    act_bytes = 2 * 2 * tb * (D + Op) * x_isz + 4 * tb * UHp
    vmem_limit = int(min(56 * 2**20, max(2 * (weight_bytes + act_bytes), 8 * 2**20)))

    def run(single_buffer_weights: bool):
        resident = {"pipeline_mode": pl.Buffered(1)} if single_buffer_weights else {}
        return pl.pallas_call(
            afn_kernel,
            out_shape=jax.ShapeDtypeStruct((B, Op), x.dtype),
            grid_spec=pltpu.PrefetchScalarGridSpec(
                num_scalar_prefetch=0,
                grid=(n_b,),
                in_specs=[
                    pl.BlockSpec((tb, D), lambda b: (b, 0)),               # x tile
                    pl.BlockSpec((D, UHp), lambda b: (0, 0), **resident),  # Wf_all (resident)
                    pl.BlockSpec((1, UHp), lambda b: (0, 0), **resident),  # bf_all (resident)
                    pl.BlockSpec((UHp, Op), lambda b: (0, 0), **resident), # Wi_cat (resident)
                    pl.BlockSpec((1, Op), lambda b: (0, 0), **resident),   # bi     (resident)
                ],
                out_specs=pl.BlockSpec((tb, Op), lambda b: (b, 0)),
            ),
            compiler_params=pltpu.CompilerParams(
                dimension_semantics=("parallel",),   # both TCs on v7x when n_b >= 2
                vmem_limit_bytes=vmem_limit,
            ),
            cost_estimate=cost,
        )(x, Wfp, bfp, Wip, bip)

    try:
        out = run(True)    # single-buffer constant-index weights (halves their VMEM)
    except Exception:
        out = run(False)   # graceful fallback to default double buffering

    return out if Op == O else out[:, :O]


def ref_forward(x, Wf, bf, Wi, bi):
    """Pure-JAX reference matching the PyTorch forward semantics."""
    U = Wf.shape[0]
    outs = [jnp.maximum(x @ Wf[u] + bf[u, 0], 0.0) for u in range(U)]
    cat = jnp.concatenate(outs, axis=1)                     # torch.cat(..., dim=1)
    Wi_cat = Wi.reshape(U * Wi.shape[1], Wi.shape[2])
    return cat @ Wi_cat + bi[0]


if __name__ == "__main__":
    # Small shapes consistent with the forward pass.
    B, D, H, O, U = 8, 32, 32, 16, 3   # batch, in_feat, hidden per unit, out, num units

    key = jax.random.PRNGKey(0)
    kx, kwf, kbf, kwi, kbi = jax.random.split(key, 5)

    x  = jax.random.normal(kx,  (B, D), dtype=jnp.float32)
    Wf = jax.random.normal(kwf, (U, D, H), dtype=jnp.float32) * 0.1
    bf = jax.random.normal(kbf, (U, 1, H), dtype=jnp.float32) * 0.1
    Wi = jax.random.normal(kwi, (U, H, O), dtype=jnp.float32) * 0.1
    bi = jax.random.normal(kbi, (1, O), dtype=jnp.float32) * 0.1

    params = prepare_afn_params(Wf, bf, Wi, bi)             # one-time (init-time) prep
    out = afn_forward(x, params)
    out = jax.block_until_ready(out)

    ref = ref_forward(x, Wf, bf, Wi, bi)
    assert out.shape == (B, O)
    assert jnp.allclose(out, ref, atol=1e-4, rtol=1e-4), "mismatch vs reference"

    print("KERNEL_OK")
</pallas_src>

<mosaic_0001>
module attributes {stable_mosaic.version = 11 : i64} {
  func.func @afn_kernel(%arg0: i32, %arg1: memref<8x32xf32, #tpu.memory_space<vmem>>, %arg2: memref<32x128xf32, #tpu.memory_space<vmem>>, %arg3: memref<1x128xf32, #tpu.memory_space<vmem>>, %arg4: memref<128x16xf32, #tpu.memory_space<vmem>>, %arg5: memref<1x16xf32, #tpu.memory_space<vmem>>, %arg6: memref<8x16xf32, #tpu.memory_space<vmem>>) attributes {dimension_semantics = [#tpu.dimension_semantics<parallel>], iteration_bounds = array<i64: 1>, scalar_prefetch = 0 : i64, scratch_operands = 0 : i64, tpu.core_type = #tpu.core_type<tc>, window_params = [{transform_indices = @transform_0, window_bounds = array<i64: 8, 32>}, {pipeline_mode = #tpu.pipeline_mode<synchronous>, transform_indices = @transform_1, window_bounds = array<i64: 32, 128>}, {pipeline_mode = #tpu.pipeline_mode<synchronous>, transform_indices = @transform_2, window_bounds = array<i64: 1, 128>}, {pipeline_mode = #tpu.pipeline_mode<synchronous>, transform_indices = @transform_3, window_bounds = array<i64: 128, 16>}, {pipeline_mode = #tpu.pipeline_mode<synchronous>, transform_indices = @transform_4, window_bounds = array<i64: 1, 16>}, {transform_indices = @transform_5, window_bounds = array<i64: 8, 16>}]} {
    %c0 = arith.constant 0 : index
    %c0_0 = arith.constant 0 : index
    %0 = vector.load %arg1[%c0, %c0_0] : memref<8x32xf32, #tpu.memory_space<vmem>>, vector<8x32xf32>
    %c0_1 = arith.constant 0 : index
    %c0_2 = arith.constant 0 : index
    %1 = vector.load %arg2[%c0_1, %c0_2] : memref<32x128xf32, #tpu.memory_space<vmem>>, vector<32x128xf32>
    %cst = arith.constant dense<0.000000e+00> : vector<8x128xf32>
    %2 = tpu.matmul %0, %1, %cst {dimension_numbers = #tpu.dot_dimension_numbers<[1], [0], [0], [1], [0, 0, 1, 1], [], []>} : vector<8x32xf32>, vector<32x128xf32>, vector<8x128xf32> -> vector<8x128xf32>
    %c0_3 = arith.constant 0 : index
    %c0_4 = arith.constant 0 : index
    %3 = vector.load %arg3[%c0_3, %c0_4] : memref<1x128xf32, #tpu.memory_space<vmem>>, vector<1x128xf32>
    %4 = vector.broadcast %3 : vector<1x128xf32> to vector<8x128xf32>
    %5 = arith.addf %2, %4 : vector<8x128xf32>
    %cst_5 = arith.constant 0.000000e+00 : f32
    %6 = vector.broadcast %cst_5 : f32 to vector<8x128xf32>
    %7 = arith.maximumf %5, %6 : vector<8x128xf32>
    %c0_6 = arith.constant 0 : index
    %c0_7 = arith.constant 0 : index
    %8 = vector.load %arg4[%c0_6, %c0_7] : memref<128x16xf32, #tpu.memory_space<vmem>>, vector<128x16xf32>
    %cst_8 = arith.constant dense<0.000000e+00> : vector<8x16xf32>
    %9 = tpu.matmul %7, %8, %cst_8 {dimension_numbers = #tpu.dot_dimension_numbers<[1], [0], [0], [1], [0, 0, 1, 1], [], []>} : vector<8x128xf32>, vector<128x16xf32>, vector<8x16xf32> -> vector<8x16xf32>
    %c0_9 = arith.constant 0 : index
    %c0_10 = arith.constant 0 : index
    %10 = vector.load %arg5[%c0_9, %c0_10] : memref<1x16xf32, #tpu.memory_space<vmem>>, vector<1x16xf32>
    %11 = vector.broadcast %10 : vector<1x16xf32> to vector<8x16xf32>
    %12 = arith.addf %9, %11 : vector<8x16xf32>
    %c0_11 = arith.constant 0 : index
    %c0_12 = arith.constant 0 : index
    %13 = vector.load %arg6[%c0_11, %c0_12] : memref<8x16xf32, #tpu.memory_space<vmem>>, vector<8x16xf32>
    tpu.vector_store %arg6[%c0_11, %c0_12], %12 {strides = array<i32>} : memref<8x16xf32, #tpu.memory_space<vmem>>, vector<8x16xf32>,
    return
  }
  func.func @transform_0(%arg0: i32) -> (i32, i32) {
    %c0_i32 = arith.constant 0 : i32
    %c0_i32_0 = arith.constant 0 : i32
    return %arg0, %c0_i32 : i32, i32
  }
  func.func @transform_1(%arg0: i32) -> (i32, i32) {
    %c0_i32 = arith.constant 0 : i32
    %c0_i32_0 = arith.constant 0 : i32
    %c0_i32_1 = arith.constant 0 : i32
    return %c0_i32, %c0_i32_0 : i32, i32
  }
  func.func @transform_2(%arg0: i32) -> (i32, i32) {
    %c0_i32 = arith.constant 0 : i32
    %c0_i32_0 = arith.constant 0 : i32
    %c0_i32_1 = arith.constant 0 : i32
    return %c0_i32, %c0_i32_0 : i32, i32
  }
  func.func @transform_3(%arg0: i32) -> (i32, i32) {
    %c0_i32 = arith.constant 0 : i32
    %c0_i32_0 = arith.constant 0 : i32
    %c0_i32_1 = arith.constant 0 : i32
    return %c0_i32, %c0_i32_0 : i32, i32
  }
  func.func @transform_4(%arg0: i32) -> (i32, i32) {
    %c0_i32 = arith.constant 0 : i32
    %c0_i32_0 = arith.constant 0 : i32
    %c0_i32_1 = arith.constant 0 : i32
    return %c0_i32, %c0_i32_0 : i32, i32
  }
  func.func @transform_5(%arg0: i32) -> (i32, i32) {
    %c0_i32 = arith.constant 0 : i32
    %c0_i32_0 = arith.constant 0 : i32
    return %arg0, %c0_i32 : i32, i32
  }
}

module attributes {stable_mosaic.version = 11 : i64} {
  func.func @afn_kernel(%arg0: i32, %arg1: memref<8x32xf32, #tpu.memory_space<vmem>>, %arg2: memref<32x128xf32, #tpu.memory_space<vmem>>, %arg3: memref<1x128xf32, #tpu.memory_space<vmem>>, %arg4: memref<128x16xf32, #tpu.memory_space<vmem>>, %arg5: memref<1x16xf32, #tpu.memory_space<vmem>>, %arg6: memref<8x16xf32, #tpu.memory_space<vmem>>) attributes {dimension_semantics = [#tpu.dimension_semantics<parallel>], iteration_bounds = array<i64: 1>, scalar_prefetch = 0 : i64, scratch_operands = 0 : i64, tpu.core_type = #tpu.core_type<tc>, window_params = [{transform_indices = @transform_0, window_bounds = array<i64: 8, 32>}, {pipeline_mode = #tpu.pipeline_mode<synchronous>, transform_indices = @transform_1, window_bounds = array<i64: 32, 128>}, {pipeline_mode = #tpu.pipeline_mode<synchronous>, transform_indices = @transform_2, window_bounds = array<i64: 1, 128>}, {pipeline_mode = #tpu.pipeline_mode<synchronous>, transform_indices = @transform_3, window_bounds = array<i64: 128, 16>}, {pipeline_mode = #tpu.pipeline_mode<synchronous>, transform_indices = @transform_4, window_bounds = array<i64: 1, 16>}, {transform_indices = @transform_5, window_bounds = array<i64: 8, 16>}]} {
    %c0 = arith.constant 0 : index
    %c0_0 = arith.constant 0 : index
    %0 = vector.load %arg1[%c0, %c0_0] : memref<8x32xf32, #tpu.memory_space<vmem>>, vector<8x32xf32>
    %c0_1 = arith.constant 0 : index
    %c0_2 = arith.constant 0 : index
    %1 = vector.load %arg2[%c0_1, %c0_2] : memref<32x128xf32, #tpu.memory_space<vmem>>, vector<32x128xf32>
    %cst = arith.constant dense<0.000000e+00> : vector<8x128xf32>
    %2 = tpu.matmul %0, %1, %cst {dimension_numbers = #tpu.dot_dimension_numbers<[1], [0], [0], [1], [0, 0, 1, 1], [], []>} : vector<8x32xf32>, vector<32x128xf32>, vector<8x128xf32> -> vector<8x128xf32>
    %c0_3 = arith.constant 0 : index
    %c0_4 = arith.constant 0 : index
    %3 = vector.load %arg3[%c0_3, %c0_4] : memref<1x128xf32, #tpu.memory_space<vmem>>, vector<1x128xf32>
    %4 = vector.broadcast %3 : vector<1x128xf32> to vector<8x128xf32>
    %5 = arith.addf %2, %4 : vector<8x128xf32>
    %cst_5 = arith.constant 0.000000e+00 : f32
    %6 = vector.broadcast %cst_5 : f32 to vector<8x128xf32>
    %7 = arith.maximumf %5, %6 : vector<8x128xf32>
    %c0_6 = arith.constant 0 : index
    %c0_7 = arith.constant 0 : index
    %8 = vector.load %arg4[%c0_6, %c0_7] : memref<128x16xf32, #tpu.memory_space<vmem>>, vector<128x16xf32>
    %cst_8 = arith.constant dense<0.000000e+00> : vector<8x16xf32>
    %9 = tpu.matmul %7, %8, %cst_8 {dimension_numbers = #tpu.dot_dimension_numbers<[1], [0], [0], [1], [0, 0, 1, 1], [], []>} : vector<8x128xf32>, vector<128x16xf32>, vector<8x16xf32> -> vector<8x16xf32>
    %c0_9 = arith.constant 0 : index
    %c0_10 = arith.constant 0 : index
    %10 = vector.load %arg5[%c0_9, %c0_10] : memref<1x16xf32, #tpu.memory_space<vmem>>, vector<1x16xf32>
    %11 = vector.broadcast %10 : vector<1x16xf32> to vector<8x16xf32>
    %12 = arith.addf %9, %11 : vector<8x16xf32>
    %c0_11 = arith.constant 0 : index
    %c0_12 = arith.constant 0 : index
    %13 = vector.load %arg6[%c0_11, %c0_12] : memref<8x16xf32, #tpu.memory_space<vmem>>, vector<8x16xf32>
    tpu.vector_store %arg6[%c0_11, %c0_12], %12 {strides = array<i32>} : memref<8x16xf32, #tpu.memory_space<vmem>>, vector<8x16xf32>,
    return
  }
  func.func @transform_0(%arg0: i32) -> (i32, i32) {
    %c0_i32 = arith.constant 0 : i32
    %c0_i32_0 = arith.constant 0 : i32
    return %arg0, %c0_i32 : i32, i32
  }
  func.func @transform_1(%arg0: i32) -> (i32, i32) {
    %c0_i32 = arith.constant 0 : i32
    %c0_i32_0 = arith.constant 0 : i32
    %c0_i32_1 = arith.constant 0 : i32
    return %c0_i32, %c0_i32_0 : i32, i32
  }
  func.func @transform_2(%arg0: i32) -> (i32, i32) {
    %c0_i32 = arith.constant 0 : i32
    %c0_i32_0 = arith.constant 0 : i32
    %c0_i32_1 = arith.constant 0 : i32
    return %c0_i32, %c0_i32_0 : i32, i32
  }
  func.func @transform_3(%arg0: i32) -> (i32, i32) {
    %c0_i32 = arith.constant 0 : i32
    %c0_i32_0 = arith.constant 0 : i32
    %c0_i32_1 = arith.constant 0 : i32
    return %c0_i32, %c0_i32_0 : i32, i32
  }
  func.func @transform_4(%arg0: i32) -> (i32, i32) {
    %c0_i32 = arith.constant 0 : i32
    %c0_i32_0 = arith.constant 0 : i32
    %c0_i32_1 = arith.constant 0 : i32
    return %c0_i32, %c0_i32_0 : i32, i32
  }
  func.func @transform_5(%arg0: i32) -> (i32, i32) {
    %c0_i32 = arith.constant 0 : i32
    %c0_i32_0 = arith.constant 0 : i32
    return %arg0, %c0_i32 : i32, i32
  }
}

</mosaic_0001>

<bundles_post_ra>
// kernel: tpu_custom_call.1
= control target key start
LH: loop header
LB: loop body
LE: loop exit
PB: predicated region body
PF: predicated region fallthrough
CT: control target
= control target key end

     0   :  { %v313_v1 = vmov 0.0   ;;  %vm314_vm0 = vmmov 0   ;;  %vm33_vm1 = vcmask 261120   ;;  %s442_s0 = inlined_call_operand.vmem [shape: f32[8,32], index: 0, kind: input, shape index: {}]   ;;  %s443_s1 = inlined_call_operand.vmem [shape: f32[32,128], index: 1, kind: input, shape index: {}]   ;;  %s444_s2 = inlined_call_operand.vmem [shape: f32[1,128], index: 2, kind: input, shape index: {}]   ;;  %s445_s3 = inlined_call_operand.vmem [shape: f32[128,16], index: 3, kind: input, shape index: {}]   ;;  %s446_s4 = inlined_call_operand.vmem [shape: f32[1,16], index: 4, kind: input, shape index: {}]   ;;  %s447_s5 = inlined_call_operand.hbm [shape: f32[8,16], index: 5, kind: output, shape index: {}]  }
   0x1   :  { %v25_v0 = vld [vmem:[%s443_s1 + $0x18] sm:$0xff]  ;;  %242 = vmatprep.subr.mxu0 %v313_v1  ;;  %v24_v2 = vld [vmem:[%s443_s1 + $0x10] sm:$0xff]  ;;  %250 = vmatprep.mubr.msk.f32.mxu0 %vm314_vm0, %v313_v1  ;;  %v23_v5 = vld [vmem:[%s443_s1 + $0x8] sm:$0xff] }
   0x2   :  { %v123_v3 = vld [vmem:[%s445_s3 + $0x78] sm:$0xff]  ;;  %243 = vmatpush3.msra.mxu0 %v25_v0  ;;  %253 = vmatprep.subr.mxu1 %v313_v1  ;;  %v122_v4 = vld [vmem:[%s445_s3 + $0x70] sm:$0xff]  ;;  %v121_v6 = vld [vmem:[%s445_s3 + $0x68] sm:$0xff] }
   0x3   :  { %244 = vmatprep.subr.mxu0 %v313_v1  ;;  %254 = vmatpush3.msra.mxu1 %v123_v3  ;;  %v22_v7 = vld [vmem:[%s443_s1] sm:$0xff] }
   0x4   :  { %245 = vmatpush3.msra.mxu0 %v24_v2  ;;  %255 = vmatprep.subr.mxu1 %v313_v1  ;;  %v21_v8 = vld [vmem:[%s442_s0] sm:$0xff] }
   0x5   :  { %246 = vmatprep.subr.mxu0 %v313_v1  ;;  %256 = vmatpush3.msra.mxu1 %v122_v4  ;;  %v120_v9 = vld [vmem:[%s445_s3 + $0x60] sm:$0xff] }
   0x6   :  { %247 = vmatpush3.msra.mxu0 %v23_v5  ;;  %257 = vmatprep.subr.mxu1 %v313_v1 }
   0x7   :  { %10 = vsyncpa [#allocation3], 0  ;;  %248 = vmatprep.subr.mxu0 %v313_v1  ;;  %258 = vmatpush3.msra.mxu1 %v121_v6  ;;  %v119_v10 = vld [vmem:[%s445_s3 + $0x58] sm:$0xff]  ;;  %v118_v11 = vld [vmem:[%s445_s3 + $0x50] sm:$0xff]  ;;  %s315_s11 = smov [#allocation2]   ;;  %vm201_vm2 = vcmask 130048  }
   0x8   :  { %249 = vmatpush3.msra.mxu0 %v22_v7  ;;  %259 = vmatprep.subr.mxu1 %v313_v1  ;;  %v117_v12 = vld [vmem:[%s445_s3 + $0x48] sm:$0xff]  ;;  %v116_v13 = vld [vmem:[%s445_s3 + $0x40] sm:$0xff]  ;;  %v115_v14 = vld [vmem:[%s445_s3 + $0x38] sm:$0xff]  ;;  %s209_s0 = sshll.u32 %s315_s11, 4  ;;  %s210_s0 = int_to_ptr.vmem [resolvable:$true] %s209_s0 }
   0x9   :  { %251 = vmatmul.mubr.msk.f32.vlgmr.msra.gmra.mxu0 %vm33_vm1, %v21_v8  ;;  %260 = vmatpush3.msra.mxu1 %v120_v9  ;;  %v114_v15 = vld [vmem:[%s445_s3 + $0x30] sm:$0xff]  ;;  %v113_v16 = vld [vmem:[%s445_s3 + $0x28] sm:$0xff]  ;;  %v112_v17 = vld [vmem:[%s445_s3 + $0x20] sm:$0xff]  ;;  %p296_p1 = scmp.lt.s32.totalorder %s210_s0, %s210_s0 }
   0xa   :  { %261 = vmatprep.subr.mxu1 %v313_v1  ;;  %285 = vmatprep.mubr.msk.f32.mxu1 %vm314_vm0, %v313_v1  ;;  %v111_v18 = vld [vmem:[%s445_s3 + $0x18] sm:$0xff]  ;;  %v110_v19 = vld [vmem:[%s445_s3 + $0x10] sm:$0xff]  ;;  %v109_v20 = vld [vmem:[%s445_s3 + $0x8] sm:$0xff] }
   0xb   :  { %262 = vmatpush3.msra.mxu1 %v119_v10  ;;  %v108_v21 = vld [vmem:[%s445_s3] sm:$0xff]  ;;  %s291_s3 = scalar_lea.vmem %s210_s0, 128 }
   0xc   :  { %263 = vmatprep.subr.mxu1 %v313_v1  ;;  %v217_v22 = vld [vmem:[%s444_s2] ss:$0 sm:$0xff]  ;;  %p292_p0 = scmp.ne.s32.totalorder %s210_s0, %s291_s3  ;;  %p297_p2 = scmp.lt.s32.totalorder %s291_s3, %s291_s3 }
   0xd   :  { %264 = vmatpush3.msra.mxu1 %v118_v11  ;;  %v219_v27 = vld [vmem:[%s446_s4] ss:$0 sm:$0xff] }
   0xe   :  { %265 = vmatprep.subr.mxu1 %v313_v1  ;;  %p298_p3 = por %p297_p2, %p296_p1 }
   0xf   :  { %266 = vmatpush3.msra.mxu1 %v117_v12 }
  0x10   :  { %267 = vmatprep.subr.mxu1 %v313_v1  ;;  %p299_p4 = pnand %p298_p3, %p292_p0 }
  0x11   :  { %268 = vmatpush3.msra.mxu1 %v116_v13 }
  0x12   :  { %269 = vmatprep.subr.mxu1 %v313_v1 }
  0x13   :  { %270 = vmatpush3.msra.mxu1 %v115_v14 }
  0x14   :  { %271 = vmatprep.subr.mxu1 %v313_v1 }
  0x15   :  { %272 = vmatpush3.msra.mxu1 %v114_v15 }
  0x16   :  { %273 = vmatprep.subr.mxu1 %v313_v1 }
  0x17   :  { %274 = vmatpush3.msra.mxu1 %v113_v16 }
  0x18   :  { %275 = vmatprep.subr.mxu1 %v313_v1 }
  0x19   :  { %276 = vmatpush3.msra.mxu1 %v112_v17 }
  0x1a   :  { %277 = vmatprep.subr.mxu1 %v313_v1 }
  0x1b   :  { %278 = vmatpush3.msra.mxu1 %v111_v18 }
  0x1c   :  { %279 = vmatprep.subr.mxu1 %v313_v1 }
  0x1d   :  { %280 = vmatpush3.msra.mxu1 %v110_v19 }
  0x1e   :  { %281 = vmatprep.subr.mxu1 %v313_v1 }
  0x1f   :  { %282 = vmatpush3.msra.mxu1 %v109_v20 }
  0x20   :  { %283 = vmatprep.subr.mxu1 %v313_v1 }
  0x21   :  { %284 = vmatpush3.msra.mxu1 %v108_v21 }
  0xc9   :  { %v103_v23 = vpop.f32.mrf.mxu0 }
  0xca   :  { %v104_v24 = vadd.f32 %v217_v22, %v103_v23 }
  0xcb   :  { %v252_v25 = vpop.f32.mrf.mxu0 }
  0xcc   :  { %v107_v26 = vmax.f32 %v104_v24, 0.0 }
  0xce   :  { %286 = vmatmul.mubr.f32.vlgmr.msra.gmra.mxu1 %v107_v26 }
 0x18e   :  { %v197_v28 = vpop.f32.mrf.mxu1 }
 0x18f   :  { %v198_v29 = vadd.f32 %v219_v27, %v197_v28 }
 0x190   :  { %v287_v30 = vpop.f32.mrf.mxu1 }
 0x191   :  { %202 = vst.msk [vmem:[#allocation2] sm:$0xff] %vm201_vm2, %v198_v29 }
 0x192   :  { %302 = shalt.err (!%p299_p4)
}
 0x193   :  { %212 = dma.vmem_to_hbm [thread:$0]  %s210_s0, 128, %s447_s5, [#allocation3]  }
 0x194   :  { %311 = dma.done.wait [#allocation3], 128  }
 0x195   :  { %312 = vsyncadd [#allocation3], 4294967168 }
 0x196   :  { %216 = vsyncpa [#allocation3], 1 }

// kernel: tpu_custom_call.1
= control target key start
LH: loop header
LB: loop body
LE: loop exit
PB: predicated region body
PF: predicated region fallthrough
CT: control target
= control target key end

     0   :  { %v313_v1 = vmov 0.0   ;;  %vm314_vm0 = vmmov 0   ;;  %vm33_vm1 = vcmask 261120   ;;  %s442_s0 = inlined_call_operand.vmem [shape: f32[8,32], index: 0, kind: input, shape index: {}]   ;;  %s443_s1 = inlined_call_operand.vmem [shape: f32[32,128], index: 1, kind: input, shape index: {}]   ;;  %s444_s2 = inlined_call_operand.vmem [shape: f32[1,128], index: 2, kind: input, shape index: {}]   ;;  %s445_s3 = inlined_call_operand.vmem [shape: f32[128,16], index: 3, kind: input, shape index: {}]   ;;  %s446_s4 = inlined_call_operand.vmem [shape: f32[1,16], index: 4, kind: input, shape index: {}]   ;;  %s447_s5 = inlined_call_operand.hbm [shape: f32[8,16], index: 5, kind: output, shape index: {}]  }
   0x1   :  { %v25_v0 = vld [vmem:[%s443_s1 + $0x18] sm:$0xff]  ;;  %242 = vmatprep.subr.mxu0 %v313_v1  ;;  %v24_v2 = vld [vmem:[%s443_s1 + $0x10] sm:$0xff]  ;;  %250 = vmatprep.mubr.msk.f32.mxu0 %vm314_vm0, %v313_v1  ;;  %v23_v5 = vld [vmem:[%s443_s1 + $0x8] sm:$0xff] }
   0x2   :  { %v123_v3 = vld [vmem:[%s445_s3 + $0x78] sm:$0xff]  ;;  %243 = vmatpush3.msra.mxu0 %v25_v0  ;;  %253 = vmatprep.subr.mxu1 %v313_v1  ;;  %v122_v4 = vld [vmem:[%s445_s3 + $0x70] sm:$0xff]  ;;  %v121_v6 = vld [vmem:[%s445_s3 + $0x68] sm:$0xff] }
   0x3   :  { %244 = vmatprep.subr.mxu0 %v313_v1  ;;  %254 = vmatpush3.msra.mxu1 %v123_v3  ;;  %v22_v7 = vld [vmem:[%s443_s1] sm:$0xff] }
   0x4   :  { %245 = vmatpush3.msra.mxu0 %v24_v2  ;;  %255 = vmatprep.subr.mxu1 %v313_v1  ;;  %v21_v8 = vld [vmem:[%s442_s0] sm:$0xff] }
   0x5   :  { %246 = vmatprep.subr.mxu0 %v313_v1  ;;  %256 = vmatpush3.msra.mxu1 %v122_v4  ;;  %v120_v9 = vld [vmem:[%s445_s3 + $0x60] sm:$0xff] }
   0x6   :  { %247 = vmatpush3.msra.mxu0 %v23_v5  ;;  %257 = vmatprep.subr.mxu1 %v313_v1 }
   0x7   :  { %10 = vsyncpa [#allocation3], 0  ;;  %248 = vmatprep.subr.mxu0 %v313_v1  ;;  %258 = vmatpush3.msra.mxu1 %v121_v6  ;;  %v119_v10 = vld [vmem:[%s445_s3 + $0x58] sm:$0xff]  ;;  %v118_v11 = vld [vmem:[%s445_s3 + $0x50] sm:$0xff]  ;;  %s315_s11 = smov [#allocation2]   ;;  %vm201_vm2 = vcmask 130048  }
   0x8   :  { %249 = vmatpush3.msra.mxu0 %v22_v7  ;;  %259 = vmatprep.subr.mxu1 %v313_v1  ;;  %v117_v12 = vld [vmem:[%s445_s3 + $0x48] sm:$0xff]  ;;  %v116_v13 = vld [vmem:[%s445_s3 + $0x40] sm:$0xff]  ;;  %v115_v14 = vld [vmem:[%s445_s3 + $0x38] sm:$0xff]  ;;  %s209_s0 = sshll.u32 %s315_s11, 4  ;;  %s210_s0 = int_to_ptr.vmem [resolvable:$true] %s209_s0 }
   0x9   :  { %251 = vmatmul.mubr.msk.f32.vlgmr.msra.gmra.mxu0 %vm33_vm1, %v21_v8  ;;  %260 = vmatpush3.msra.mxu1 %v120_v9  ;;  %v114_v15 = vld [vmem:[%s445_s3 + $0x30] sm:$0xff]  ;;  %v113_v16 = vld [vmem:[%s445_s3 + $0x28] sm:$0xff]  ;;  %v112_v17 = vld [vmem:[%s445_s3 + $0x20] sm:$0xff]  ;;  %p296_p1 = scmp.lt.s32.totalorder %s210_s0, %s210_s0 }
   0xa   :  { %261 = vmatprep.subr.mxu1 %v313_v1  ;;  %285 = vmatprep.mubr.msk.f32.mxu1 %vm314_vm0, %v313_v1  ;;  %v111_v18 = vld [vmem:[%s445_s3 + $0x18] sm:$0xff]  ;;  %v110_v19 = vld [vmem:[%s445_s3 + $0x10] sm:$0xff]  ;;  %v109_v20 = vld [vmem:[%s445_s3 + $0x8] sm:$0xff] }
   0xb   :  { %262 = vmatpush3.msra.mxu1 %v119_v10  ;;  %v108_v21 = vld [vmem:[%s445_s3] sm:$0xff]  ;;  %s291_s3 = scalar_lea.vmem %s210_s0, 128 }
   0xc   :  { %263 = vmatprep.subr.mxu1 %v313_v1  ;;  %v217_v22 = vld [vmem:[%s444_s2] ss:$0 sm:$0xff]  ;;  %p292_p0 = scmp.ne.s32.totalorder %s210_s0, %s291_s3  ;;  %p297_p2 = scmp.lt.s32.totalorder %s291_s3, %s291_s3 }
   0xd   :  { %264 = vmatpush3.msra.mxu1 %v118_v11  ;;  %v219_v27 = vld [vmem:[%s446_s4] ss:$0 sm:$0xff] }
   0xe   :  { %265 = vmatprep.subr.mxu1 %v313_v1  ;;  %p298_p3 = por %p297_p2, %p296_p1 }
   0xf   :  { %266 = vmatpush3.msra.mxu1 %v117_v12 }
  0x10   :  { %267 = vmatprep.subr.mxu1 %v313_v1  ;;  %p299_p4 = pnand %p298_p3, %p292_p0 }
  0x11   :  { %268 = vmatpush3.msra.mxu1 %v116_v13 }
  0x12   :  { %269 = vmatprep.subr.mxu1 %v313_v1 }
  0x13   :  { %270 = vmatpush3.msra.mxu1 %v115_v14 }
  0x14   :  { %271 = vmatprep.subr.mxu1 %v313_v1 }
  0x15   :  { %272 = vmatpush3.msra.mxu1 %v114_v15 }
  0x16   :  { %273 = vmatprep.subr.mxu1 %v313_v1 }
  0x17   :  { %274 = vmatpush3.msra.mxu1 %v113_v16 }
  0x18   :  { %275 = vmatprep.subr.mxu1 %v313_v1 }
  0x19   :  { %276 = vmatpush3.msra.mxu1 %v112_v17 }
  0x1a   :  { %277 = vmatprep.subr.mxu1 %v313_v1 }
  0x1b   :  { %278 = vmatpush3.msra.mxu1 %v111_v18 }
  0x1c   :  { %279 = vmatprep.subr.mxu1 %v313_v1 }
  0x1d   :  { %280 = vmatpush3.msra.mxu1 %v110_v19 }
  0x1e   :  { %281 = vmatprep.subr.mxu1 %v313_v1 }
  0x1f   :  { %282 = vmatpush3.msra.mxu1 %v109_v20 }
  0x20   :  { %283 = vmatprep.subr.mxu1 %v313_v1 }
  0x21   :  { %284 = vmatpush3.msra.mxu1 %v108_v21 }
  0xc9   :  { %v103_v23 = vpop.f32.mrf.mxu0 }
  0xca   :  { %v104_v24 = vadd.f32 %v217_v22, %v103_v23 }
  0xcb   :  { %v252_v25 = vpop.f32.mrf.mxu0 }
  0xcc   :  { %v107_v26 = vmax.f32 %v104_v24, 0.0 }
  0xce   :  { %286 = vmatmul.mubr.f32.vlgmr.msra.gmra.mxu1 %v107_v26 }
 0x18e   :  { %v197_v28 = vpop.f32.mrf.mxu1 }
 0x18f   :  { %v198_v29 = vadd.f32 %v219_v27, %v197_v28 }
 0x190   :  { %v287_v30 = vpop.f32.mrf.mxu1 }
 0x191   :  { %202 = vst.msk [vmem:[#allocation2] sm:$0xff] %vm201_vm2, %v198_v29 }
 0x192   :  { %302 = shalt.err (!%p299_p4)
}
 0x193   :  { %212 = dma.vmem_to_hbm [thread:$0]  %s210_s0, 128, %s447_s5, [#allocation3]  }
 0x194   :  { %311 = dma.done.wait [#allocation3], 128  }
 0x195   :  { %312 = vsyncadd [#allocation3], 4294967168 }
 0x196   :  { %216 = vsyncpa [#allocation3], 1 }

</bundles_post_ra>
